<compile_context>
chip_gen: v5e
topology: v5e:2x2
jax: 0.10.0
libtpu: 0.0.40
codegen_flags: <defaults>
</compile_context>

<pallas_src>
import functools

import jax
import jax.numpy as jnp
from jax.experimental import pallas as pl
from jax.experimental.pallas import tpu as pltpu

_LANE = 128
_SUBLANE = 8
_MIN_TILE_ROWS = 512     # ~85% of HBM roofline already at 512-row (256 KiB f32) tiles
_MAX_TILE_ROWS = 2048    # 1 MiB per f32 buffer; 2x(in+out) double-buffered ~= 4 MiB VMEM
_TARGET_BLOCKS = 8       # >=4-8 balanced blocks keeps both v7x TCs busy and pipelined


def _S(bits):
    return 2.0 ** (bits - 1)


def _clip_bounds(bits_A):
    """C(x, bits): clamp bounds. delta = 0 for bits == 1 or bits > 15."""
    if bits_A > 15 or bits_A == 1:
        delta = 0.0
    else:
        delta = 1.0 / _S(bits_A)
    return -1.0 + delta, 1.0 - delta


def _wage_quant_jnp(x, bits_A):
    """Pure-jnp WAGE forward (C then Q). Ragged fallback + test reference."""
    if bits_A == -1:
        return x
    lo, hi = _clip_bounds(bits_A)
    xf = jnp.clip(x.astype(jnp.float32), lo, hi)
    if bits_A == 1:
        q = jnp.sign(xf)
    elif bits_A > 15:
        q = xf
    else:
        s = _S(bits_A)
        q = jnp.round(xf * s) * (1.0 / s)
    return q.astype(x.dtype)


def _wage_quant_kernel(x_ref, o_ref, *, bits_A):
    # f32 compute so clip/round match PyTorch math regardless of storage dtype.
    # NOTE: for bf16/fp16 storage the quantized value is double-rounded on the
    # way back to the narrow dtype (same behaviour as running the PyTorch module
    # on that low-precision dtype); intentional.
    x = x_ref[...].astype(jnp.float32)
    lo, hi = _clip_bounds(bits_A)
    x = jnp.clip(x, lo, hi)                       # C(x, bits_A)
    if bits_A == 1:                               # Q(x, bits_A)
        x = jnp.sign(x)
    elif bits_A <= 15:
        s = _S(bits_A)
        x = jnp.round(x * s) * (1.0 / s)
    # bits_A > 15: pass-through after clamp.
    o_ref[...] = x.astype(o_ref.dtype)


def _choose_tile_rows(rows):
    """Row-tile heuristic: big, balanced, 8-row-aligned blocks; one block if small."""
    if rows < _TARGET_BLOCKS * _MIN_TILE_ROWS:
        # Small tensor: single full-extent block (always a legal block shape).
        # Sub-512-row tiles lose DMA efficiency and each extra grid step costs
        # ~0.35 us; at this size the call is overhead-dominated on v7x anyway.
        return rows
    tile = pl.cdiv(rows, _TARGET_BLOCKS)
    tile = max(_MIN_TILE_ROWS, min(_MAX_TILE_ROWS, tile))
    return pl.cdiv(tile, _SUBLANE) * _SUBLANE     # sublane-aligned


def wage_quantizer(x, bits_A=8, bits_E=8, *, donate_input=False):
    """Forward of WAGEQuantizer(bits_A, bits_E).

    bits_E only matters for the custom backward (not implemented here).
    Set donate_input=True (and donate x at the jit boundary) to alias the output
    onto the input buffer and halve peak HBM allocation; leaving it False avoids
    a defensive copy when the caller still holds x.
    """
    del bits_E  # TODO(synk): bits_E drives the custom backward (QE); forward-only here.

    # Host-side short-circuits: identity config / empty tensor -> no kernel launch.
    if bits_A == -1 or x.size == 0:
        return x

    orig_shape = x.shape
    orig_dtype = x.dtype
    n = x.size

    if n % _LANE != 0:
        # Ragged flat size (rare for real activations).  A padded Pallas round
        # trip (pad-concat + out[:n] slice) costs ~2 extra full HBM passes on a
        # purely bandwidth-bound op, so one fused XLA elementwise pass is the
        # roofline-optimal choice here.
        # TODO(synk): add a manual-DMA Pallas path handling the <128-elem tail
        # in-kernel if ragged activation sizes ever become hot.
        return _wage_quant_jnp(x, bits_A)

    rows = n // _LANE
    x2d = x.reshape(rows, _LANE)                  # free bitcast for contiguous x

    tile_rows = _choose_tile_rows(rows)
    grid = (pl.cdiv(rows, tile_rows),)            # partial tail block masked by Pallas

    kernel = functools.partial(_wage_quant_kernel, bits_A=bits_A)
    itemsize = x.dtype.itemsize

    out2d = pl.pallas_call(
        kernel,
        out_shape=jax.ShapeDtypeStruct((rows, _LANE), orig_dtype),
        grid=grid,
        in_specs=[pl.BlockSpec((tile_rows, _LANE), lambda i: (i, 0))],
        out_specs=pl.BlockSpec((tile_rows, _LANE), lambda i: (i, 0)),
        # A 1-D "parallel" grid lets the runtime shard row-blocks across v7x's
        # two TensorCores; on 1-TC chips (v5e/v6e) it behaves like "arbitrary".
        # TODO(synk): if a v7x profile shows only one TC active, switch to a
        # leading size-2 CORE_PARALLEL grid axis (or pl.core_map) per core.
        compiler_params=pltpu.CompilerParams(
            dimension_semantics=("parallel",),
        ),
        # Mem-bound elementwise: give XLA's scheduler the true traffic picture.
        cost_estimate=pl.CostEstimate(
            flops=5 * n, transcendentals=0, bytes_accessed=2 * n * itemsize
        ),
        input_output_aliases=({0: 0} if donate_input else {}),
    )(x2d)

    return out2d.reshape(orig_shape)


if __name__ == "__main__":
    key = jax.random.PRNGKey(0)
    keys = jax.random.split(key, 3)

    # Main case: NCHW activation (flat size 2048 = 16*128 -> zero-copy Pallas path).
    x = jax.random.normal(keys[0], (2, 4, 16, 16), dtype=jnp.float32) * 1.5
    y = jax.block_until_ready(wage_quantizer(x, bits_A=8, bits_E=8))
    assert y.shape == x.shape and y.dtype == x.dtype
    assert jnp.allclose(y, _wage_quant_jnp(x, bits_A=8), atol=1e-6), "mismatch (bits_A=8)"

    # Multi-block grid with a masked tail block: rows = 4104 -> 8 blocks of 520 rows.
    x_big = jax.random.normal(keys[1], (1026, 512), dtype=jnp.float32) * 1.5
    y_big = jax.block_until_ready(wage_quantizer(x_big, bits_A=8, bits_E=8))
    assert jnp.allclose(y_big, _wage_quant_jnp(x_big, bits_A=8), atol=1e-6), "mismatch (multi-block)"

    # 1-bit (sign) and >15-bit (clamp-only pass-through) configurations.
    y1 = jax.block_until_ready(wage_quantizer(x, bits_A=1, bits_E=8))
    assert jnp.allclose(y1, _wage_quant_jnp(x, bits_A=1), atol=1e-6), "mismatch (bits_A=1)"
    y16 = jax.block_until_ready(wage_quantizer(x, bits_A=16, bits_E=8))
    assert jnp.allclose(y16, _wage_quant_jnp(x, bits_A=16), atol=1e-6), "mismatch (bits_A=16)"

    # Ragged flat size (1155, not a multiple of 128) takes the fused-jnp fallback.
    x_rag = jax.random.normal(keys[2], (3, 5, 7, 11), dtype=jnp.float32) * 1.5
    y_rag = jax.block_until_ready(wage_quantizer(x_rag, bits_A=4, bits_E=8))
    assert jnp.allclose(y_rag, _wage_quant_jnp(x_rag, bits_A=4), atol=1e-6), "mismatch (ragged)"

    # Identity configuration short-circuits (no kernel launch).
    y_id = wage_quantizer(x, bits_A=-1, bits_E=8)
    assert jnp.allclose(y_id, x), "bits_A=-1 should be identity"

    print("KERNEL_OK")
</pallas_src>

<mosaic_0001>
module attributes {stable_mosaic.version = 11 : i64} {
  func.func @_wage_quant_kernel(%arg0: i32, %arg1: memref<16x128xf32, #tpu.memory_space<vmem>>, %arg2: memref<16x128xf32, #tpu.memory_space<vmem>>) attributes {dimension_semantics = [#tpu.dimension_semantics<parallel>], iteration_bounds = array<i64: 1>, scalar_prefetch = 0 : i64, scratch_operands = 0 : i64, tpu.core_type = #tpu.core_type<tc>, window_params = [{transform_indices = @transform_0, window_bounds = array<i64: 16, 128>}, {transform_indices = @transform_1, window_bounds = array<i64: 16, 128>}]} {
    %c0 = arith.constant 0 : index
    %c0_0 = arith.constant 0 : index
    %0 = vector.load %arg1[%c0, %c0_0] : memref<16x128xf32, #tpu.memory_space<vmem>>, vector<16x128xf32>
    %cst = arith.constant -0.9921875 : f32
    %cst_1 = arith.constant 0.9921875 : f32
    %1 = vector.broadcast %cst : f32 to vector<16x128xf32>
    %2 = arith.maximumf %1, %0 : vector<16x128xf32>
    %3 = vector.broadcast %cst_1 : f32 to vector<16x128xf32>
    %4 = arith.minimumf %3, %2 : vector<16x128xf32>
    %cst_2 = arith.constant 1.280000e+02 : f32
    %5 = vector.broadcast %cst_2 : f32 to vector<16x128xf32>
    %6 = arith.mulf %4, %5 : vector<16x128xf32>
    %7 = math.roundeven %6 : vector<16x128xf32>
    %cst_3 = arith.constant 7.812500e-03 : f32
    %8 = vector.broadcast %cst_3 : f32 to vector<16x128xf32>
    %9 = arith.mulf %7, %8 : vector<16x128xf32>
    %c0_4 = arith.constant 0 : index
    %c0_5 = arith.constant 0 : index
    %10 = vector.load %arg2[%c0_4, %c0_5] : memref<16x128xf32, #tpu.memory_space<vmem>>, vector<16x128xf32>
    tpu.vector_store %arg2[%c0_4, %c0_5], %9 {strides = array<i32>} : memref<16x128xf32, #tpu.memory_space<vmem>>, vector<16x128xf32>,
    return
  }
  func.func @transform_0(%arg0: i32) -> (i32, i32) {
    %c0_i32 = arith.constant 0 : i32
    %c0_i32_0 = arith.constant 0 : i32
    return %arg0, %c0_i32 : i32, i32
  }
  func.func @transform_1(%arg0: i32) -> (i32, i32) {
    %c0_i32 = arith.constant 0 : i32
    %c0_i32_0 = arith.constant 0 : i32
    return %arg0, %c0_i32 : i32, i32
  }
}

</mosaic_0001>

<bundles_post_ra>
// kernel: tpu_custom_call.1
= control target key start
LH: loop header
LB: loop body
LE: loop exit
PB: predicated region body
PF: predicated region fallthrough
CT: control target
= control target key end

     0   :  { %6 = vsyncpa [#allocation3], 0  ;;  %s158_s0 = inlined_call_operand.hbm [shape: f32[16,128], index: 0, kind: input, shape index: {}]   ;;  %s159_s1 = inlined_call_operand.hbm [shape: f32[16,128], index: 1, kind: output, shape index: {}]  }
   0x1   :  { %7 = vsyncpa [#allocation4], 0  ;;  %s12_s8 = sshll.u32 %s158_s0, 4  ;;  %s132_s9 = smov [#allocation2]   ;;  %s13_s8 = int_to_ptr.hbm [resolvable:$true] %s12_s8 }
   0x2   :  { %s14_s10 = sshll.u32 %s132_s9, 4  ;;  %s133_s11 = smov 128   ;;  %s15_s10 = int_to_ptr.vmem [resolvable:$true] %s14_s10 }
   0x3   :  { %s134_s12 = smov 8  }
   0x4   :  { %20 = dma.hbm_to_vmem [thread:$0]  %s13_s8, 256, %s15_s10, [#allocation3], %s133_s11, %s133_s11, %s134_s12  }
   0x5   :  { %128 = dma.done.wait [#allocation3], 256  }
   0x6   :  { %129 = vsyncadd [#allocation3], 4294967040  ;;  %v25_v0 = vld [vmem:[#allocation2] sm:$0xff]  ;;  %v26_v1 = vld [vmem:[#allocation2 + $0x8] sm:$0xff]  ;;  %s135_s0 = smov [#allocation5]   ;;  %s45_s16 = sshll.u32 %s159_s1, 4  ;;  %s46_s16 = int_to_ptr.hbm [resolvable:$true] %s45_s16 }
   0x7   :  { %v58_v2 = vclamps-f32 %v25_v0, 0.9921875  ;;  %v59_v3 = vclamps-f32 %v26_v1, 0.9921875  ;;  %s43_s13 = sshll.u32 %s135_s0, 4  ;;  %s44_s13 = int_to_ptr.vmem [resolvable:$true] %s43_s13 }
   0x9   :  { %v31_v4 = vmul.f32 128.0, %v58_v2  ;;  %v32_v5 = vmul.f32 128.0, %v59_v3 }
   0xb   :  { %v62_v6 = vcvt.f32.s32 %v31_v4  ;;  %v60_v7 = vand.u32 2147483647, %v31_v4  ;;  %v70_v8 = vcvt.f32.s32 %v32_v5  ;;  %v65_v10 = vand.u32 2147483648, %v31_v4 }
   0xc   :  { %v68_v11 = vand.u32 2147483647, %v32_v5  ;;  %v73_v13 = vand.u32 2147483648, %v32_v5 }
   0xd   :  { %v63_v9 = vcvt.s32.f32 %v62_v6  ;;  %v71_v12 = vcvt.s32.f32 %v70_v8  ;;  %vm61_vm0 = vcmp.lt.f32.partialorder %v60_v7, 8388608.0 }
   0xe   :  { %vm69_vm1 = vcmp.lt.f32.partialorder %v68_v11, 8388608.0 }
   0xf   :  { %v64_v14 = vand.u32 2147483647, %v63_v9  ;;  %v72_v15 = vand.u32 2147483647, %v71_v12 }
  0x11   :  { %v66_v16 = vor.u32 %v65_v10, %v64_v14  ;;  %v74_v17 = vor.u32 %v73_v13, %v72_v15 }
  0x13   :  { %v67_v18 = vsel %vm61_vm0, %v66_v16, %v31_v4  ;;  %v75_v20 = vsel %vm69_vm1, %v74_v17, %v32_v5 }
  0x14   :  { %v35_v19 = vmul.f32 0.0078125, %v67_v18  ;;  %v36_v21 = vmul.f32 0.0078125, %v75_v20 }
  0x16   :  { %37 = vst [vmem:[#allocation5] sm:$0xff] %v35_v19 }
  0x17   :  { %38 = vst [vmem:[#allocation5 + $0x8] sm:$0xff] %v36_v21 }
  0x18   :  { %51 = dma.vmem_to_hbm [thread:$0]  %s44_s13, 256, %s46_s16, [#allocation4], %s133_s11, %s133_s11, %s134_s12  }
  0x19   :  { %130 = dma.done.wait [#allocation4], 256  }
  0x1a   :  { %131 = vsyncadd [#allocation4], 4294967040 }
  0x1b   :  { %56 = vsyncpa [#allocation3], 1 }
  0x1c   :  { %57 = vsyncpa [#allocation4], 1 }

</bundles_post_ra>
